<compile_context>
chip_gen: v5e
topology: v5e:2x2
jax: 0.10.0
libtpu: 0.0.40
codegen_flags: <defaults>
</compile_context>

<pallas_src>
import functools

import jax
import jax.numpy as jnp
from jax import lax
from jax.experimental import pallas as pl
from jax.experimental.pallas import tpu as pltpu


def _s4_scan_kernel(u_ref, apow_ref, bt_ref, ct_ref, d_ref, o_ref, st_ref):
    """One (batch-tile, L-chunk) block of the LiquidS4 cell.

    u_ref:    (tb, tl, Dp)  input chunk (f32 or bf16)                 VMEM
    apow_ref: (tl, Np)      row t = a^(t+1)                           VMEM
    bt_ref:   (Dp, Np)      B^T (zero-padded)                         VMEM
    ct_ref:   (Np, Dp)      C^T (zero-padded)                         VMEM
    d_ref:    (1,  Dp)      skip gain D (zero-padded)                 VMEM
    o_ref:    (tb, tl, Dp)  output chunk (f32)                        VMEM
    st_ref:   (tb, Np)      recurrent state carried across L-chunks (scratch)
    """
    tb, tl, d_pad = u_ref.shape
    n_pad = bt_ref.shape[-1]

    # Zero the carried state at the first L-chunk of every batch tile.
    @pl.when(pl.program_id(1) == 0)
    def _():
        st_ref[...] = jnp.zeros_like(st_ref)

    # (1) Input projection: ONE MXU matmul over the whole chunk.
    v = jnp.dot(
        u_ref[...].reshape(tb * tl, d_pad),
        bt_ref[...],
        preferred_element_type=jnp.float32,
    ).reshape(tb, tl, n_pad)

    # (2) Vectorized log-step scan over time (a is time-constant):
    #     after pass k, s[t] = sum_{t-2^k < j <= t} a^(t-j) * v[j].
    apow = apow_ref[...]                                    # (tl, Np)
    time_idx = lax.broadcasted_iota(jnp.int32, (tb, tl, n_pad), 1)
    s = v
    a_pow = apow[0:1, :].reshape(1, 1, n_pad)               # a^1
    shift = 1
    while shift < tl:                                       # static: ceil(log2(tl)) passes
        rolled = pltpu.roll(s, shift=shift, axis=1)         # XLU sublane rotate
        rolled = jnp.where(time_idx >= shift, rolled, 0.0)  # zero wrapped entries
        s = s + a_pow * rolled                              # VPU FMA
        a_pow = a_pow * a_pow                               # a^(2^k) -> a^(2^(k+1))
        shift *= 2

    # (3) Fold in the cross-chunk initial state and carry the last state:
    #     x[t] = s[t] + a^(t+1) * x_init ;  x_init_next = x[tl-1].
    x_init = st_ref[...]                                    # (tb, Np)
    states = s + apow[None, :, :] * x_init[:, None, :]      # (tb, tl, Np)
    st_ref[...] = states[:, tl - 1, :]                      # ONE store per chunk

    # (4) Output projection + skip: ONE MXU matmul, lane-dense store.
    y = jnp.dot(
        states.astype(ct_ref.dtype).reshape(tb * tl, n_pad),
        ct_ref[...],
        preferred_element_type=jnp.float32,
    ).reshape(tb, tl, d_pad)
    o_ref[...] = (y + d_ref[...] * u_ref[...]).astype(o_ref.dtype)


def _round_up(x: int, m: int) -> int:
    return (x + m - 1) // m * m


@functools.partial(jax.jit, static_argnames=("block_b", "block_l", "mxu_bf16"))
def liquid_s4_cell(u, Lambda, log_dt, B, C, D, *, block_b=8, block_l=256,
                   mxu_bf16=False):
    """u: (batch, length, d_model) -> (batch, length, d_model)."""
    bsz, L, d_model = u.shape
    N = Lambda.shape[0]

    # All transcendentals stay in the XLA wrapper.
    dt = jnp.exp(log_dt.astype(jnp.float32))                    # (1,)
    a = jnp.exp(dt * (-jnp.exp(Lambda.astype(jnp.float32))))    # (N,)

    # Pad state (N) and model (d_model) dims to lane width (128) so every
    # vreg lane / MXU output column is used and stores are lane-dense.
    n_pad = _round_up(N, 128)
    d_pad = _round_up(d_model, 128)

    # Tiling. Keep >= 2 batch tiles when possible so the "parallel" axis can
    # shard across v7x's two TensorCores.
    tb = min(block_b, bsz)
    if bsz >= 2 and pl.cdiv(bsz, tb) < 2:
        tb = pl.cdiv(bsz, 2)
    tl = min(block_l, L)
    grid = (pl.cdiv(bsz, tb), pl.cdiv(L, tl))

    # Precomputed decay powers a^(t+1), t in [0, tl): fold the cross-chunk
    # initial state; row 0 (a^1) seeds the in-kernel squaring chain.
    a_p = jnp.pad(a, (0, n_pad - N))
    apow = a_p[None, :] ** jnp.arange(1, tl + 1, dtype=jnp.float32)[:, None]

    mm_dtype = jnp.bfloat16 if mxu_bf16 else jnp.float32
    u_p = jnp.pad(u.astype(jnp.float32),
                  ((0, 0), (0, 0), (0, d_pad - d_model))).astype(mm_dtype)
    bt = jnp.pad(B.astype(jnp.float32).T,
                 ((0, d_pad - d_model), (0, n_pad - N))).astype(mm_dtype)
    ct = jnp.pad(C.astype(jnp.float32).T,
                 ((0, n_pad - N), (0, d_pad - d_model))).astype(mm_dtype)
    dvec = jnp.pad(D.astype(jnp.float32), (0, d_pad - d_model)).reshape(1, d_pad)

    # Explicit scoped-VMEM budget: in/out double buffers + weights + scratch +
    # scan temporaries, capped below v7x's 64 MiB physical VMEM.
    bpe = 2 if mxu_bf16 else 4
    est = (2 * tb * tl * d_pad * bpe + 2 * tb * tl * d_pad * 4
           + 2 * tl * n_pad * 4 + 2 * 2 * d_pad * n_pad * bpe
           + tb * n_pad * 4 + 4 * tb * tl * n_pad * 4)
    vmem_limit = int(min(max(2 * est, 32 * 1024 * 1024), 56 * 1024 * 1024))

    k_steps = (tl - 1).bit_length()
    flops = (4 * bsz * L * d_pad * n_pad
             + 2 * (k_steps + 1) * bsz * L * n_pad
             + 2 * bsz * L * d_pad)
    bytes_accessed = (bpe * bsz * L * d_pad + 4 * bsz * L * d_pad
                      + 2 * bpe * d_pad * n_pad + 4 * tl * n_pad + 4 * d_pad)

    out = pl.pallas_call(
        _s4_scan_kernel,
        out_shape=jax.ShapeDtypeStruct((bsz, L, d_pad), jnp.float32),
        grid_spec=pltpu.PrefetchScalarGridSpec(
            num_scalar_prefetch=0,
            grid=grid,
            in_specs=[
                pl.BlockSpec((tb, tl, d_pad), lambda i, l: (i, l, 0)),
                pl.BlockSpec((tl, n_pad), lambda i, l: (0, 0)),
                pl.BlockSpec((d_pad, n_pad), lambda i, l: (0, 0)),
                pl.BlockSpec((n_pad, d_pad), lambda i, l: (0, 0)),
                pl.BlockSpec((1, d_pad), lambda i, l: (0, 0)),
            ],
            out_specs=pl.BlockSpec((tb, tl, d_pad), lambda i, l: (i, l, 0)),
            scratch_shapes=[pltpu.VMEM((tb, n_pad), jnp.float32)],
        ),
        compiler_params=pltpu.CompilerParams(
            dimension_semantics=("parallel", "arbitrary"),
            vmem_limit_bytes=vmem_limit,
        ),
        cost_estimate=pl.CostEstimate(
            flops=flops, transcendentals=0, bytes_accessed=bytes_accessed),
    )(u_p, apow, bt, ct, dvec)

    return out[:, :, :d_model].astype(u.dtype)


# ----------------------- pure-JAX reference (for verification) -----------------------
def _cell_ref(u, Lambda, log_dt, B, C, D):
    dt = jnp.exp(log_dt)
    a = jnp.exp(dt * (-jnp.exp(Lambda)))                     # (N,)

    def step(state, u_t):
        state = state * a + u_t @ B.T
        y = state @ C.T + D * u_t
        return state, y

    x0 = jnp.zeros((u.shape[0], Lambda.shape[0]), jnp.float32)
    _, ys = lax.scan(step, x0, jnp.swapaxes(u, 0, 1))
    return jnp.swapaxes(ys, 0, 1)


# ------------------------------------- main -------------------------------------
if __name__ == "__main__":
    batch, seq_len, d_model, N = 2, 8, 32, 64

    key = jax.random.PRNGKey(0)
    k1, k2, k3, k4, kx = jax.random.split(key, 5)
    Lambda = jax.random.normal(k1, (N,), jnp.float32)
    log_dt = jnp.zeros((1,), jnp.float32)
    Bm = jax.random.normal(k2, (N, d_model), jnp.float32)
    Cm = jax.random.normal(k3, (d_model, N), jnp.float32)
    Dv = 0.1 * jax.random.normal(k4, (d_model,), jnp.float32)
    u = jax.random.normal(kx, (batch, seq_len, d_model), jnp.float32)

    # Single-chunk configuration (matches the module's small-shape forward).
    out = liquid_s4_cell(u, Lambda, log_dt, Bm, Cm, Dv)
    out = jax.block_until_ready(out)
    ref = _cell_ref(u, Lambda, log_dt, Bm, Cm, Dv)
    assert out.shape == (batch, seq_len, d_model)
    assert jnp.allclose(out, ref, atol=2e-3, rtol=2e-3), (
        float(jnp.max(jnp.abs(out - ref))))

    # Multi-chunk / multi-batch-tile configuration: exercises the cross-chunk
    # state carry and the two-batch-tile "parallel" axis (v7x dual TC).
    u2 = jax.random.normal(jax.random.PRNGKey(1), (4, 64, d_model), jnp.float32)
    out2 = liquid_s4_cell(u2, Lambda, log_dt, Bm, Cm, Dv, block_b=4, block_l=16)
    out2 = jax.block_until_ready(out2)
    ref2 = _cell_ref(u2, Lambda, log_dt, Bm, Cm, Dv)
    assert jnp.allclose(out2, ref2, atol=5e-3, rtol=5e-3), (
        float(jnp.max(jnp.abs(out2 - ref2))))

    print("KERNEL_OK")
</pallas_src>

<mosaic_0001>
module attributes {stable_mosaic.version = 11 : i64} {
  func.func @_s4_scan_kernel(%arg0: i32, %arg1: i32, %arg2: memref<1x8x128xf32, #tpu.memory_space<vmem>>, %arg3: memref<8x128xf32, #tpu.memory_space<vmem>>, %arg4: memref<128x128xf32, #tpu.memory_space<vmem>>, %arg5: memref<128x128xf32, #tpu.memory_space<vmem>>, %arg6: memref<1x128xf32, #tpu.memory_space<vmem>>, %arg7: memref<1x8x128xf32, #tpu.memory_space<vmem>>, %arg8: memref<1x128xf32, #tpu.memory_space<vmem>>) attributes {dimension_semantics = [#tpu.dimension_semantics<parallel>, #tpu.dimension_semantics<arbitrary>], iteration_bounds = array<i64: 2, 1>, scalar_prefetch = 0 : i64, scratch_operands = 1 : i64, tpu.core_type = #tpu.core_type<tc>, window_params = [{transform_indices = @transform_0, window_bounds = array<i64: 1, 8, 128>}, {pipeline_mode = #tpu.pipeline_mode<synchronous>, transform_indices = @transform_1, window_bounds = array<i64: 8, 128>}, {pipeline_mode = #tpu.pipeline_mode<synchronous>, transform_indices = @transform_2, window_bounds = array<i64: 128, 128>}, {pipeline_mode = #tpu.pipeline_mode<synchronous>, transform_indices = @transform_3, window_bounds = array<i64: 128, 128>}, {pipeline_mode = #tpu.pipeline_mode<synchronous>, transform_indices = @transform_4, window_bounds = array<i64: 1, 128>}, {transform_indices = @transform_5, window_bounds = array<i64: 1, 8, 128>}]} {
    %c0_i32 = arith.constant 0 : i32
    %0 = arith.cmpi eq, %arg1, %c0_i32 : i32
    %1 = arith.extui %0 : i1 to i32
    %c0_i32_0 = arith.constant 0 : i32
    %2 = arith.cmpi ne, %1, %c0_i32_0 : i32
    scf.if %2 {
      %cst_28 = arith.constant 0.000000e+00 : f32
      %58 = vector.broadcast %cst_28 : f32 to vector<1x128xf32>
      %c0_29 = arith.constant 0 : index
      %c0_30 = arith.constant 0 : index
      %59 = vector.load %arg8[%c0_29, %c0_30] : memref<1x128xf32, #tpu.memory_space<vmem>>, vector<1x128xf32>
      tpu.vector_store %arg8[%c0_29, %c0_30], %58 {strides = array<i32>} : memref<1x128xf32, #tpu.memory_space<vmem>>, vector<1x128xf32>,
    } else {
    }
    %c0 = arith.constant 0 : index
    %c0_1 = arith.constant 0 : index
    %c0_2 = arith.constant 0 : index
    %3 = vector.load %arg2[%c0, %c0_1, %c0_2] : memref<1x8x128xf32, #tpu.memory_space<vmem>>, vector<1x8x128xf32>
    %4 = vector.shape_cast %3 : vector<1x8x128xf32> to vector<8x128xf32>
    %c0_3 = arith.constant 0 : index
    %c0_4 = arith.constant 0 : index
    %5 = vector.load %arg4[%c0_3, %c0_4] : memref<128x128xf32, #tpu.memory_space<vmem>>, vector<128x128xf32>
    %cst = arith.constant dense<0.000000e+00> : vector<8x128xf32>
    %6 = tpu.matmul %4, %5, %cst {dimension_numbers = #tpu.dot_dimension_numbers<[1], [0], [0], [1], [0, 0, 1, 1], [], []>} : vector<8x128xf32>, vector<128x128xf32>, vector<8x128xf32> -> vector<8x128xf32>
    %7 = vector.shape_cast %6 : vector<8x128xf32> to vector<1x8x128xf32>
    %c0_5 = arith.constant 0 : index
    %c0_6 = arith.constant 0 : index
    %8 = vector.load %arg3[%c0_5, %c0_6] : memref<8x128xf32, #tpu.memory_space<vmem>>, vector<8x128xf32>
    %9 = tpu.iota {dimensions = array<i32: 1>} : vector<1x8x128xi32>
    %10 = vector.extract_strided_slice %8 {offsets = [0, 0], sizes = [1, 128], strides = [1, 1]} : vector<8x128xf32> to vector<1x128xf32>
    %11 = vector.shape_cast %10 : vector<1x128xf32> to vector<1x1x128xf32>
    %c1_i32 = arith.constant 1 : i32
    %12 = tpu.dynamic_rotate %7 by %c1_i32 dim 1 : vector<1x8x128xf32>, i32 -> vector<1x8x128xf32>
    %c1_i32_7 = arith.constant 1 : i32
    %13 = vector.broadcast %c1_i32_7 : i32 to vector<1x8x128xi32>
    %14 = arith.cmpi sge, %9, %13 : vector<1x8x128xi32>
    %cst_8 = arith.constant 0.000000e+00 : f32
    %15 = vector.broadcast %cst_8 : f32 to vector<1x8x128xf32>
    %16 = arith.select %14, %12, %15 : vector<1x8x128xi1>, vector<1x8x128xf32>
    %17 = vector.broadcast %11 : vector<1x1x128xf32> to vector<1x8x128xf32>
    %18 = arith.mulf %17, %16 : vector<1x8x128xf32>
    %19 = arith.addf %7, %18 : vector<1x8x128xf32>
    %20 = arith.mulf %11, %11 : vector<1x1x128xf32>
    %c2_i32 = arith.constant 2 : i32
    %21 = tpu.dynamic_rotate %19 by %c2_i32 dim 1 : vector<1x8x128xf32>, i32 -> vector<1x8x128xf32>
    %c2_i32_9 = arith.constant 2 : i32
    %22 = vector.broadcast %c2_i32_9 : i32 to vector<1x8x128xi32>
    %23 = arith.cmpi sge, %9, %22 : vector<1x8x128xi32>
    %cst_10 = arith.constant 0.000000e+00 : f32
    %24 = vector.broadcast %cst_10 : f32 to vector<1x8x128xf32>
    %25 = arith.select %23, %21, %24 : vector<1x8x128xi1>, vector<1x8x128xf32>
    %26 = vector.broadcast %20 : vector<1x1x128xf32> to vector<1x8x128xf32>
    %27 = arith.mulf %26, %25 : vector<1x8x128xf32>
    %28 = arith.addf %19, %27 : vector<1x8x128xf32>
    %29 = arith.mulf %20, %20 : vector<1x1x128xf32>
    %c4_i32 = arith.constant 4 : i32
    %30 = tpu.dynamic_rotate %28 by %c4_i32 dim 1 : vector<1x8x128xf32>, i32 -> vector<1x8x128xf32>
    %c4_i32_11 = arith.constant 4 : i32
    %31 = vector.broadcast %c4_i32_11 : i32 to vector<1x8x128xi32>
    %32 = arith.cmpi sge, %9, %31 : vector<1x8x128xi32>
    %cst_12 = arith.constant 0.000000e+00 : f32
    %33 = vector.broadcast %cst_12 : f32 to vector<1x8x128xf32>
    %34 = arith.select %32, %30, %33 : vector<1x8x128xi1>, vector<1x8x128xf32>
    %35 = vector.broadcast %29 : vector<1x1x128xf32> to vector<1x8x128xf32>
    %36 = arith.mulf %35, %34 : vector<1x8x128xf32>
    %37 = arith.addf %28, %36 : vector<1x8x128xf32>
    %c0_13 = arith.constant 0 : index
    %c0_14 = arith.constant 0 : index
    %38 = vector.load %arg8[%c0_13, %c0_14] : memref<1x128xf32, #tpu.memory_space<vmem>>, vector<1x128xf32>
    %39 = vector.shape_cast %8 : vector<8x128xf32> to vector<1x8x128xf32>
    %40 = vector.shape_cast %38 : vector<1x128xf32> to vector<1x1x128xf32>
    %41 = vector.broadcast %40 : vector<1x1x128xf32> to vector<1x8x128xf32>
    %42 = arith.mulf %39, %41 : vector<1x8x128xf32>
    %43 = arith.addf %37, %42 : vector<1x8x128xf32>
    %44 = vector.extract_strided_slice %43 {offsets = [0, 7, 0], sizes = [1, 1, 128], strides = [1, 1, 1]} : vector<1x8x128xf32> to vector<1x1x128xf32>
    %45 = vector.shape_cast %44 : vector<1x1x128xf32> to vector<1x128xf32>
    %c0_15 = arith.constant 0 : index
    %c0_16 = arith.constant 0 : index
    %46 = vector.load %arg8[%c0_15, %c0_16] : memref<1x128xf32, #tpu.memory_space<vmem>>, vector<1x128xf32>
    tpu.vector_store %arg8[%c0_15, %c0_16], %45 {strides = array<i32>} : memref<1x128xf32, #tpu.memory_space<vmem>>, vector<1x128xf32>,
    %47 = vector.shape_cast %43 : vector<1x8x128xf32> to vector<8x128xf32>
    %c0_17 = arith.constant 0 : index
    %c0_18 = arith.constant 0 : index
    %48 = vector.load %arg5[%c0_17, %c0_18] : memref<128x128xf32, #tpu.memory_space<vmem>>, vector<128x128xf32>
    %cst_19 = arith.constant dense<0.000000e+00> : vector<8x128xf32>
    %49 = tpu.matmul %47, %48, %cst_19 {dimension_numbers = #tpu.dot_dimension_numbers<[1], [0], [0], [1], [0, 0, 1, 1], [], []>} : vector<8x128xf32>, vector<128x128xf32>, vector<8x128xf32> -> vector<8x128xf32>
    %50 = vector.shape_cast %49 : vector<8x128xf32> to vector<1x8x128xf32>
    %c0_20 = arith.constant 0 : index
    %c0_21 = arith.constant 0 : index
    %51 = vector.load %arg6[%c0_20, %c0_21] : memref<1x128xf32, #tpu.memory_space<vmem>>, vector<1x128xf32>
    %c0_22 = arith.constant 0 : index
    %c0_23 = arith.constant 0 : index
    %c0_24 = arith.constant 0 : index
    %52 = vector.load %arg2[%c0_22, %c0_23, %c0_24] : memref<1x8x128xf32, #tpu.memory_space<vmem>>, vector<1x8x128xf32>
    %53 = vector.shape_cast %51 : vector<1x128xf32> to vector<1x1x128xf32>
    %54 = vector.broadcast %53 : vector<1x1x128xf32> to vector<1x8x128xf32>
    %55 = arith.mulf %54, %52 : vector<1x8x128xf32>
    %56 = arith.addf %50, %55 : vector<1x8x128xf32>
    %c0_25 = arith.constant 0 : index
    %c0_26 = arith.constant 0 : index
    %c0_27 = arith.constant 0 : index
    %57 = vector.load %arg7[%c0_25, %c0_26, %c0_27] : memref<1x8x128xf32, #tpu.memory_space<vmem>>, vector<1x8x128xf32>
    tpu.vector_store %arg7[%c0_25, %c0_26, %c0_27], %56 {strides = array<i32>} : memref<1x8x128xf32, #tpu.memory_space<vmem>>, vector<1x8x128xf32>,
    return
  }
  func.func @transform_0(%arg0: i32, %arg1: i32) -> (i32, i32, i32) {
    %c0_i32 = arith.constant 0 : i32
    %c0_i32_0 = arith.constant 0 : i32
    return %arg0, %arg1, %c0_i32 : i32, i32, i32
  }
  func.func @transform_1(%arg0: i32, %arg1: i32) -> (i32, i32) {
    %c0_i32 = arith.constant 0 : i32
    %c0_i32_0 = arith.constant 0 : i32
    %c0_i32_1 = arith.constant 0 : i32
    return %c0_i32, %c0_i32_0 : i32, i32
  }
  func.func @transform_2(%arg0: i32, %arg1: i32) -> (i32, i32) {
    %c0_i32 = arith.constant 0 : i32
    %c0_i32_0 = arith.constant 0 : i32
    %c0_i32_1 = arith.constant 0 : i32
    return %c0_i32, %c0_i32_0 : i32, i32
  }
  func.func @transform_3(%arg0: i32, %arg1: i32) -> (i32, i32) {
    %c0_i32 = arith.constant 0 : i32
    %c0_i32_0 = arith.constant 0 : i32
    %c0_i32_1 = arith.constant 0 : i32
    return %c0_i32, %c0_i32_0 : i32, i32
  }
  func.func @transform_4(%arg0: i32, %arg1: i32) -> (i32, i32) {
    %c0_i32 = arith.constant 0 : i32
    %c0_i32_0 = arith.constant 0 : i32
    %c0_i32_1 = arith.constant 0 : i32
    return %c0_i32, %c0_i32_0 : i32, i32
  }
  func.func @transform_5(%arg0: i32, %arg1: i32) -> (i32, i32, i32) {
    %c0_i32 = arith.constant 0 : i32
    %c0_i32_0 = arith.constant 0 : i32
    return %arg0, %arg1, %c0_i32 : i32, i32, i32
  }
}

</mosaic_0001>

<bundles_post_ra>
// kernel: liquid_s4_cell.1
= control target key start
LH: loop header
LB: loop body
LE: loop exit
PB: predicated region body
PF: predicated region fallthrough
CT: control target
= control target key end

     0   :  { %10 = vsyncpa [#allocation4], 0  ;;  %s832_s0 = inlined_call_operand.vmem [shape: f32[2,8,128], index: 0, kind: input, shape index: {}]   ;;  %s833_s1 = inlined_call_operand.vmem [shape: f32[8,128], index: 1, kind: input, shape index: {}]   ;;  %s834_s2 = inlined_call_operand.vmem [shape: f32[128,128], index: 2, kind: input, shape index: {}]   ;;  %s835_s3 = inlined_call_operand.vmem [shape: f32[128,128], index: 3, kind: input, shape index: {}]   ;;  %s836_s4 = inlined_call_operand.vmem [shape: f32[1,128], index: 4, kind: input, shape index: {}]   ;;  %s837_s5 = inlined_call_operand.hbm [shape: f32[2,8,128], index: 5, kind: output, shape index: {}]  }
   0x1   :  { %12 = vsyncpa [#allocation4 + $0x1], 0  ;;  %s629_s18 = smov 0   ;;  %s631_s19 = smov 0  }
   0x2   :  { %s633_s20 = smov 0   ;;  %s635_s21 = smov 0  }
   0x3   :  { %s637_s22 = smov 0   ;;  %s639_s23 = smov 0  }
   0x4 LB: > { %s449_s24 = sadd.s32 4294967295, %s596_s23   ;;  %s450_s25 = sadd.s32 4294967294, %s596_s23   ;;  %s596_s23 = sphi %s639_s23, %s18_s23   ;;  %s592_s22 = sphi %s637_s22, %s844_s22   ;;  %s588_s21 = sphi %s635_s21, %s843_s21   ;;  %s584_s20 = sphi %s633_s20, %s842_s20   ;;  %s580_s19 = sphi %s631_s19, %s841_s19   ;;  %s576_s18 = sphi %s629_s18, %s840_s18  }
   0x5   : > { %s30_s26 = sadd.s32 1, %s592_s22  ;;  %s151_s27 = sadd.s32 1, %s584_s20 }
   0x6   : > { %p32_p0 = scmp.ge.s32.totalorder %s30_s26, 2  ;;  %p161_p1 = scmp.ne.s32.totalorder %s584_s20, %s580_s19 }
   0x7   : > { %p162_p2 = scmp.eq.s32.totalorder %s449_s24, 1  ;;  %p167_p3 = scmp.ne.s32.totalorder %s580_s19, %s576_s18 }
   0x8   : > { %s846_s26 = smov (%p32_p0, %s30_s26), 0  ;;  %p168_p5 = scmp.eq.s32.totalorder %s450_s25, 1 }
   0x9   : > { %p669_p4 = por %p162_p2, %p161_p1  ;;  %s146_s29 = ssub.s32 %s592_s22, %s846_s26 }
   0xa   : > { %p453_p6 = scmp.ge.s32.totalorder %s596_s23, 1  ;;  %p149_p7 = scmp.eq.s32.totalorder %s146_s29, 0 }
   0xb   : > { %p676_p8 = por %p168_p5, %p167_p3  ;;  %p208_p9 = scmp.lt.s32.totalorder %s596_s23, 3 }
   0xc   : > { %s682_s6 = scalar_select %p149_p7, %s584_s20, %s151_s27  }
   0xd   : > { %p209_p10 = pnand %p453_p6, %p208_p9 }
   0xe   : > { %p238_p11 = scmp.lt.s32.totalorder (!%p209_p10), %s588_s21, 1  ;;  %s235_s24 = sand.u32 (!%p209_p10), 1, %s580_s19  }
   0xf   : > { %212 = sbr.rel (%p209_p10) target bundleno = 332 (0x14c), region = 40  ;;  %s457_s27 = sshll.u32 (!%p209_p10), %s588_s21, 3 }
  0x10   : > { %s373_s10 = scalar_lea.hbm (!%p209_p10), %s837_s5, %s457_s27  ;;  %s538_s27 = scalar_lea.hbm (!%p209_p10), %s837_s5, 16 }
  0x11   : > { %s377_s13 = sshll.u32 (!%p209_p10), %s373_s10, 4  ;;  %s378_s13 = int_to_ptr.hbm [resolvable:$true] %s377_s13 }
  0x12   : > { %s532_s14 = sshra.s32 (!%p209_p10), %s378_s13, 4  ;;  %s533_s14 = int_to_ptr.hbm [resolvable:$true] %s532_s14 }
  0x13   : > { %s534_s15 = scalar_lea.hbm (!%p209_p10), %s533_s14, 8  ;;  %p539_p1 = scmp.lt.s32.totalorder (!%p209_p10), %s533_s14, %s837_s5 }
  0x14   : > { %v266_v0 = vld [vmem:[%s834_s2 + $0x78] sm:$0xff]  ;;  %v265_v1 = vld [vmem:[%s834_s2 + $0x70] sm:$0xff]  ;;  %v264_v2 = vld [vmem:[%s834_s2 + $0x68] sm:$0xff]  ;;  %s239_s7 = scalar_select %p238_p11, %s588_s21, 1  ;;  %v598_v27 = vmov 0.0   ;;  %v288_v34 = vlaneseq }
  0x15   : > { %267 = vmatpush.msra.mxu0 %v266_v0  ;;  %v263_v3 = vld [vmem:[%s834_s2 + $0x60] sm:$0xff]  ;;  %v332_v4 = vld [vmem:[%s835_s3 + $0x78] sm:$0xff]  ;;  %v331_v5 = vld [vmem:[%s835_s3 + $0x70] sm:$0xff]  ;;  %249 = vst [vmem:[#allocation2] sm:$0x1] %v598_v27  ;;  %s362_s21 = scalar_lea.sflag [#allocation4], %s235_s24  ;;  %p535_p12 = scmp.ne.s32.totalorder %s533_s14, %s534_s15 }
  0x16   : > { %v262_v6 = vld [vmem:[%s834_s2 + $0x58] sm:$0xff]  ;;  %333 = vmatpush.msra.mxu1 %v332_v4  ;;  %v330_v7 = vld [vmem:[%s835_s3 + $0x68] sm:$0xff]  ;;  %v261_v8 = vld [vmem:[%s834_s2 + $0x50] sm:$0xff]  ;;  %s455_s12 = sshll.u32 %s239_s7, 3  ;;  %v289_v35 = vshrl.u32 %v288_v34, 7  ;;  %p540_p2 = scmp.lt.s32.totalorder %s538_s27, %s534_s15 }
  0x17   : > { %268 = vmatpush.msra.mxu0 %v265_v1  ;;  %v329_v9 = vld [vmem:[%s835_s3 + $0x60] sm:$0xff]  ;;  %v260_v10 = vld [vmem:[%s834_s2 + $0x48] sm:$0xff]  ;;  %v258_v12 = vld [vmem:[%s834_s2 + $0x38] sm:$0xff]  ;;  %s244_s25 = scalar_lea.vmem %s832_s0, %s455_s12  ;;  %p536_p13 = pnand %p535_p12, %p669_p4 }
  0x18   : > { %334 = vmatpush.msra.mxu1 %v331_v5  ;;  %v259_v11 = vld [vmem:[%s834_s2 + $0x40] sm:$0xff]  ;;  %v257_v13 = vld [vmem:[%s834_s2 + $0x30] sm:$0xff]  ;;  %v256_v14 = vld [vmem:[%s834_s2 + $0x28] sm:$0xff]  ;;  %vm291_vm0 = vcmp.ge.s32.totalorder %v289_v35, 1  ;;  %vm298_vm1 = vcmp.ge.s32.totalorder %v289_v35, 2  ;;  %vm305_vm2 = vcmp.ge.s32.totalorder %v289_v35, 4  ;;  %p541_p3 = por %p540_p2, %p539_p1 }
  0x19   : > { %269 = vmatpush.msra.mxu0 %v264_v2  ;;  %v255_v15 = vld [vmem:[%s834_s2 + $0x20] sm:$0xff]  ;;  %v254_v16 = vld [vmem:[%s834_s2 + $0x18] sm:$0xff]  ;;  %v253_v17 = vld [vmem:[%s834_s2 + $0x10] sm:$0xff]  ;;  %p537_p0 = pneg %p536_p13 }
  0x1a   : > { %335 = vmatpush.msra.mxu1 %v330_v7  ;;  %v252_v18 = vld [vmem:[%s834_s2 + $0x8] sm:$0xff]  ;;  %v251_v19 = vld [vmem:[%s834_s2] sm:$0xff]  ;;  %v328_v21 = vld [vmem:[%s835_s3 + $0x58] sm:$0xff] }
  0x1b   : > { %270 = vmatpush.msra.mxu0 %v263_v3  ;;  %v749_v20 = vld [vmem:[%s244_s25] sm:$0xff]  ;;  %v327_v22 = vld [vmem:[%s835_s3 + $0x50] sm:$0xff]  ;;  %v326_v23 = vld [vmem:[%s835_s3 + $0x48] sm:$0xff]  ;;  %s454_s25 = sshll.u32 %s235_s24, 3  ;;  %p542_p5 = pnand %p541_p3, %p537_p0 }
  0x1c   : > { %336 = vmatpush.msra.mxu1 %v329_v9  ;;  %v325_v24 = vld [vmem:[%s835_s3 + $0x40] sm:$0xff]  ;;  %v324_v25 = vld [vmem:[%s835_s3 + $0x38] sm:$0xff]  ;;  %v323_v26 = vld [vmem:[%s835_s3 + $0x30] sm:$0xff]  ;;  %s237_s11 = scalar_lea.vmem [#allocation3], %s454_s25 }
  0x1d   : > { %271 = vmatpush.msra.mxu0 %v262_v6  ;;  %v322_v28 = vld [vmem:[%s835_s3 + $0x28] sm:$0xff]  ;;  %v321_v29 = vld [vmem:[%s835_s3 + $0x20] sm:$0xff]  ;;  %v320_v30 = vld [vmem:[%s835_s3 + $0x18] sm:$0xff]  ;;  %s375_s12 = sshll.u32 %s237_s11, 4  ;;  %s376_s12 = int_to_ptr.vmem [resolvable:$true] %s375_s12 }
  0x1e   : > { %337 = vmatpush.msra.mxu1 %v328_v21  ;;  %v319_v31 = vld [vmem:[%s835_s3 + $0x10] sm:$0xff]  ;;  %v318_v32 = vld [vmem:[%s835_s3 + $0x8] sm:$0xff]  ;;  %v317_v33 = vld [vmem:[%s835_s3] sm:$0xff] }
  0x1f   : > { %272 = vmatpush.msra.mxu0 %v261_v8  ;;  %v287_v36 = vld [vmem:[%s833_s1] sm:$0xff] }
  0x20   : > { %338 = vmatpush.msra.mxu1 %v327_v22  ;;  %v293_v38 = vperm.slane %v287_v36, 0  ;;  %v296_v41 = vmul.f32 %v287_v36, %v287_v36  ;;  %v516_v51 = vld [vmem:[#allocation2] ss:$0 sm:$0xff] }
  0x21   : > { %273 = vmatpush.msra.mxu0 %v260_v10  ;;  %v314_v55 = vmul.f32 %v516_v51, %v287_v36  ;;  %v517_v58 = vld [vmem:[%s836_s4] ss:$0 sm:$0xff] }
  0x22   : > { %339 = vmatpush.msra.mxu1 %v326_v23  ;;  %v300_v44 = vperm.slane %v296_v41, 0  ;;  %v303_v47 = vmul.f32 %v296_v41, %v296_v41  ;;  %v358_v59 = vmul.f32 %v517_v58, %v749_v20 }
  0x23   : > { %274 = vmatpush.msra.mxu0 %v259_v11 }
  0x24   : > { %340 = vmatpush.msra.mxu1 %v325_v24  ;;  %v307_v50 = vperm.slane %v303_v47, 0 }
  0x25   : > { %275 = vmatpush.msra.mxu0 %v258_v12 }
  0x26   : > { %341 = vmatpush.msra.mxu1 %v324_v25 }
  0x27   : > { %276 = vmatpush.msra.mxu0 %v257_v13 }
  0x28   : > { %342 = vmatpush.msra.mxu1 %v323_v26 }
  0x29   : > { %277 = vmatpush.msra.mxu0 %v256_v14 }
  0x2a   : > { %343 = vmatpush.msra.mxu1 %v322_v28 }
  0x2b   : > { %278 = vmatpush.msra.mxu0 %v255_v15 }
  0x2c   : > { %344 = vmatpush.msra.mxu1 %v321_v29 }
  0x2d   : > { %279 = vmatpush.msra.mxu0 %v254_v16 }
  0x2e   : > { %345 = vmatpush.msra.mxu1 %v320_v30 }
  0x2f   : > { %280 = vmatpush.msra.mxu0 %v253_v17 }
  0x30   : > { %346 = vmatpush.msra.mxu1 %v319_v31 }
  0x31   : > { %281 = vmatpush.msra.mxu0 %v252_v18 }
  0x32   : > { %347 = vmatpush.msra.mxu1 %v318_v32 }
  0x33   : > { %282 = vmatpush.msra.mxu0 %v251_v19 }
  0x34   : > { %283 = vmatmul.f32.vlgmr.msra.gmra.mxu0 %v749_v20  ;;  %348 = vmatpush.msra.mxu1 %v317_v33 }
  0xb1   : > { %v284_v37 = vpop.f32.mrf.mxu0 }
  0xb2   : > { %v290_v39 = vrot.slane %v284_v37, 7 }
  0xb4   : > { %v292_v40 = vsel %vm291_vm0, %v290_v39, 0.0 }
  0xb5   : > { %v294_v42 = vmul.f32 %v293_v38, %v292_v40 }
  0xb7   : > { %v295_v43 = vadd.f32 %v294_v42, %v284_v37 }
  0xb9   : > { %v297_v45 = vrot.slane %v295_v43, 6 }
  0xbb   : > { %v299_v46 = vsel %vm298_vm1, %v297_v45, 0.0 }
  0xbc   : > { %v301_v48 = vmul.f32 %v300_v44, %v299_v46 }
  0xbe   : > { %v302_v49 = vadd.f32 %v301_v48, %v295_v43 }
  0xc0   : > { %v304_v52 = vrot.slane %v302_v49, 4 }
  0xc2   : > { %v306_v53 = vsel %vm305_vm2, %v304_v52, 0.0 }
  0xc3   : > { %v308_v54 = vmul.f32 %v307_v50, %v306_v53 }
  0xc5   : > { %v309_v56 = vadd.f32 %v308_v54, %v302_v49 }
  0xc7   : > { %v315_v57 = vadd.f32 %v314_v55, %v309_v56 }
  0xc9   : > { %316 = vst [vmem:[#allocation2 - $0x7] sm:$0x80] %v315_v57  ;;  %349 = vmatmul.f32.vlgmr.msra.gmra.mxu1 %v315_v57 }
 0x146   : > { %v350_v60 = vpop.f32.mrf.mxu1 }
 0x147   : > { %v359_v61 = vadd.f32 %v358_v59, %v350_v60 }
 0x149   : > { %360 = vst [vmem:[%s237_s11] sm:$0xff] %v359_v61 }
 0x14a   : > { %545 = shalt.err (!%p542_p5)
}
 0x14b   : > { %460 = dma.vmem_to_hbm [thread:$0]  (%p669_p4), %s376_s12, 128, %s378_s13, %s362_s21  }
 0x14c PF: > { %p466_p6 = scmp.ge.s32.totalorder %s596_s23, 2  ;;  %s389_s24 = sand.u32 1, %s576_s18  }
 0x14d   : > { %s390_s7 = scalar_lea.sflag [#allocation4], %s389_s24 }
 0x14e   : > { %p463_p7 = pnand %p466_p6, %p676_p8 }
 0x150   : > { %p464_p9 = pneg %p463_p7 }
 0x152   : > { %571 = dma.done.wait (%p464_p9), %s390_s7, 128  }
 0x153   : > { %573 = vsyncadd (%p464_p9), %s390_s7, 4294967168  ;;  %s18_s23 = sadd.s32 1, %s596_s23   ;;  %s840_s18 = smov %s580_s19 }
 0x154   : > { %p15_p10 = scmp.ge.s32.totalorder %s18_s23, 4   ;;  %s841_s19 = smov %s584_s20 }
 0x155   : > { %s842_s20 = smov %s682_s6  ;;  %s843_s21 = smov %s592_s22 }
 0x156   : > { %s844_s22 = smov %s846_s26  ;;  %17 = sbr.rel (!%p15_p10) target bundleno = 4 (0x4), region = 79 }
 0x15b   :  { %396 = vsyncpa [#allocation4], 1 }
 0x15c   :  { %398 = vsyncpa [#allocation4 + $0x1], 1 }

</bundles_post_ra>
